<compile_context>
chip_gen: v7x
topology: tpu7x:2x2x1
jax: 0.10.0
libtpu: 0.0.40
codegen_flags: <defaults>
</compile_context>

<pallas_src>
from typing import NamedTuple

import jax
import jax.numpy as jnp
from jax.experimental import pallas as pl
from jax.experimental.pallas import tpu as pltpu


def _round_up(x: int, m: int) -> int:
    return ((x + m - 1) // m) * m


def _largest_divisor_leq(n: int, target: int) -> int:
    for d in range(min(n, max(target, 1)), 0, -1):
        if n % d == 0:
            return d
    return 1


class CoreRNNParams(NamedTuple):
    wi_t: jax.Array   # (Kin, Hp)  = Wi^T, zero-padded on the output (lane) dim
    wh_t: jax.Array   # (Hp, Hp)   = Wh^T, zero-padded on both dims
    b: jax.Array      # (1, Hp)    = bi + bh, zero-padded (kept f32)
    input_size: int
    hidden_size: int
    h_pad: int


def prepare_core_rnn_params(wi, bi, wh, bh, *, compute_dtype=jnp.float32) -> CoreRNNParams:
    """One-time packing: transpose + zero-pad the two nn.Linear layers.

    Use compute_dtype=jnp.bfloat16 on v6e/v7x for the native MXU rate; the
    recurrence accumulator stays f32 regardless.
    """
    hidden_size, input_size = wi.shape
    hp = _round_up(hidden_size, 128)

    wi_t = jnp.zeros((input_size, hp), compute_dtype)
    wi_t = wi_t.at[:, :hidden_size].set(wi.T.astype(compute_dtype))

    wh_t = jnp.zeros((hp, hp), compute_dtype)
    wh_t = wh_t.at[:hidden_size, :hidden_size].set(wh.T.astype(compute_dtype))

    b = jnp.zeros((1, hp), jnp.float32)
    b = b.at[0, :hidden_size].set((bi + bh).astype(jnp.float32))

    return CoreRNNParams(wi_t, wh_t, b, input_size, hidden_size, hp)


# ----------------------------------------------------------------------------
# Scan kernel: one grid step = (one batch block) x (one chunk of Tc timesteps).
# ----------------------------------------------------------------------------
def _core_rnn_scan_kernel(h0_ref, g_ref, wi_ref, wh_ref, b_ref, o_ref, h_buf):
    # Re-seed the carried hidden state at the first time chunk of each batch block.
    @pl.when(pl.program_id(1) == 0)
    def _init():
        h_buf[...] = h0_ref[...]

    tc, bb, kin = g_ref.shape
    hp = wh_ref.shape[1]
    cd = wi_ref.dtype

    # ---- Parallel half (no sequential dependency): input projection for the
    # whole chunk as ONE big-M MXU matmul, f32 accumulation. ----------------
    g_flat = g_ref[...].reshape(tc * bb, kin).astype(cd)
    z = jnp.dot(g_flat, wi_ref[...], preferred_element_type=jnp.float32)
    z = z.reshape(tc, bb, hp) + b_ref[...]          # (1, Hp) bias broadcasts

    wh = wh_ref[...]                                # hoist resident Wh^T load

    # ---- Serial half: tiny recurrence, only h @ Wh^T + z_t, relu. ----------
    # Static full unroll over the chunk (tc is small); indices are Python ints
    # so every load/store is static.
    # TODO(synk): if still MXU-issue-bound at M == bb, hold Wh^T in MXU weight
    # registers across steps via pltpu.matmul_push_rhs / matmul_acc_lhs.
    h = h_buf[...]                                  # carried in f32
    for t in range(tc):
        h = jnp.maximum(
            z[t] + jnp.dot(h.astype(cd), wh, preferred_element_type=jnp.float32),
            0.0,
        )
        o_ref[t] = h.astype(o_ref.dtype)
    h_buf[...] = h


def core_rnn_scan(g_seq, h0, params: CoreRNNParams, *, t_chunk=None,
                  batch_block=None, out_dtype=None):
    """Run T CoreRNN steps inside one pallas_call. Returns all hidden states (T, B, H)."""
    T, B, kin = g_seq.shape
    assert kin == params.input_size
    H, hp = params.hidden_size, params.h_pad
    cd = params.wi_t.dtype
    out_dtype = g_seq.dtype if out_dtype is None else out_dtype

    bp = _round_up(B, 8)
    bb = bp if batch_block is None else _round_up(batch_block, 8)
    if bp % bb != 0:
        bb = bp
    # Time-chunk size: largest divisor of T <= target (no sequence re-pad needed).
    tc = _largest_divisor_leq(T, 16 if t_chunk is None else t_chunk)

    # Only pad when actually required (avoids a full-sequence HBM copy when B%8==0).
    if bp != B:
        g_in = jnp.zeros((T, bp, kin), g_seq.dtype).at[:, :B, :].set(g_seq)
    else:
        g_in = g_seq
    if bp != B or hp != H:
        h0_in = jnp.zeros((bp, hp), jnp.float32).at[:B, :H].set(h0.astype(jnp.float32))
    else:
        h0_in = h0.astype(jnp.float32)

    grid = (bp // bb, T // tc)

    # Rough VMEM footprint (resident weights/bias/h0 + double-buffered streamed
    # blocks + scratch), with 2x headroom; never below the v6e/v7x default.
    gsz = jnp.dtype(g_in.dtype).itemsize
    csz = jnp.dtype(cd).itemsize
    osz = jnp.dtype(out_dtype).itemsize
    est = ((kin * hp + hp * hp) * csz + hp * 4 + 2 * bb * hp * 4
           + 2 * tc * bb * kin * gsz + 2 * tc * bb * hp * osz + bb * hp * 4)
    vmem_limit = int(min(max(32 * 1024 * 1024, 2 * est), 128 * 1024 * 1024))

    # For very large H on v7x (64 MiB VMEM), additionally consider
    # pipeline_mode=pl.Buffered(1) on the constant-index_map inputs below so the
    # resident weights are not double-buffered.
    out = pl.pallas_call(
        _core_rnn_scan_kernel,
        out_shape=jax.ShapeDtypeStruct((T, bp, hp), out_dtype),
        grid_spec=pltpu.PrefetchScalarGridSpec(
            num_scalar_prefetch=0,
            grid=grid,
            in_specs=[
                pl.BlockSpec((bb, hp), lambda i, c: (i, 0)),           # h0 (resident per batch block)
                pl.BlockSpec((tc, bb, kin), lambda i, c: (c, i, 0)),   # g chunk (streamed)
                pl.BlockSpec((kin, hp), lambda i, c: (0, 0)),          # Wi^T (resident)
                pl.BlockSpec((hp, hp), lambda i, c: (0, 0)),           # Wh^T (resident)
                pl.BlockSpec((1, hp), lambda i, c: (0, 0)),            # bias (resident, (1,Hp))
            ],
            out_specs=pl.BlockSpec((tc, bb, hp), lambda i, c: (c, i, 0)),
            scratch_shapes=[pltpu.VMEM((bb, hp), jnp.float32)],        # carried hidden state (f32)
        ),
        compiler_params=pltpu.CompilerParams(
            # batch axis parallel (v7x two-TC sharding); time axis is a true
            # recurrence and MUST stay "arbitrary".
            dimension_semantics=("parallel", "arbitrary"),
            vmem_limit_bytes=vmem_limit,
        ),
    )(h0_in, g_in, params.wi_t, params.wh_t, params.b)

    return out[:, :B, :H]


def core_rnn_forward(g_t, h_t_prev, params: CoreRNNParams, **kwargs):
    """Single RAM-core step, matching CoreRNN.forward exactly (scan with T=1)."""
    return core_rnn_scan(g_t[None], h_t_prev, params, **kwargs)[0]


# ----------------------------------------------------------------------------
# Pure-JAX references
# ----------------------------------------------------------------------------
def _ref_step(g_t, h_prev, wi, bi, wh, bh):
    return jax.nn.relu(g_t @ wi.T + bi + h_prev @ wh.T + bh)


def _ref_scan(g_seq, h0, wi, bi, wh, bh):
    def step(h, g):
        h_new = _ref_step(g, h, wi, bi, wh, bh)
        return h_new, h_new
    _, hs = jax.lax.scan(step, h0, g_seq)
    return hs


if __name__ == "__main__":
    B = 8
    input_size = 64
    hidden_size = 32
    T = 6

    key = jax.random.PRNGKey(0)
    kg_, kh_, kwi, kbi, kwh, kbh, kseq, kodd = jax.random.split(key, 8)

    g_t = jax.random.normal(kg_, (B, input_size), dtype=jnp.float32)
    h_prev = jax.random.normal(kh_, (B, hidden_size), dtype=jnp.float32)

    # PyTorch nn.Linear parameter shapes: weight (out, in), bias (out,).
    wi = jax.random.normal(kwi, (hidden_size, input_size), dtype=jnp.float32) * 0.1
    bi = jax.random.normal(kbi, (hidden_size,), dtype=jnp.float32) * 0.1
    wh = jax.random.normal(kwh, (hidden_size, hidden_size), dtype=jnp.float32) * 0.1
    bh = jax.random.normal(kbh, (hidden_size,), dtype=jnp.float32) * 0.1

    # f32 parameter packing (reference-tolerance path).
    params = prepare_core_rnn_params(wi, bi, wh, bh, compute_dtype=jnp.float32)

    # --- single step (matches CoreRNN.forward) ---
    h_t = jax.block_until_ready(core_rnn_forward(g_t, h_prev, params))
    ref = _ref_step(g_t, h_prev, wi, bi, wh, bh)
    assert h_t.shape == (B, hidden_size)
    assert jnp.allclose(h_t, ref, atol=1e-5, rtol=1e-5), "single-step mismatch"

    # --- full recurrence inside one kernel (chunked time, resident weights) ---
    g_seq = jax.random.normal(kseq, (T, B, input_size), dtype=jnp.float32)
    hs = jax.block_until_ready(core_rnn_scan(g_seq, h_prev, params))
    ref_hs = _ref_scan(g_seq, h_prev, wi, bi, wh, bh)
    assert hs.shape == (T, B, hidden_size)
    assert jnp.allclose(hs, ref_hs, atol=1e-4, rtol=1e-4), "scan mismatch"

    # --- odd shapes (B not multiple of 8, T prime) exercise the padding path ---
    B2, T2 = 5, 7
    g_seq2 = jax.random.normal(kodd, (T2, B2, input_size), dtype=jnp.float32)
    h0_2 = h_prev[:B2]
    hs2 = jax.block_until_ready(core_rnn_scan(g_seq2, h0_2, params))
    ref_hs2 = _ref_scan(g_seq2, h0_2, wi, bi, wh, bh)
    assert hs2.shape == (T2, B2, hidden_size)
    assert jnp.allclose(hs2, ref_hs2, atol=1e-4, rtol=1e-4), "odd-shape scan mismatch"

    # --- bf16 compute path (v6e/v7x MXU rate); f32 carry/accumulation kept ---
    params_bf16 = prepare_core_rnn_params(wi, bi, wh, bh, compute_dtype=jnp.bfloat16)
    hs_bf16 = jax.block_until_ready(core_rnn_scan(g_seq, h_prev, params_bf16))
    assert hs_bf16.shape == (T, B, hidden_size)
    assert jnp.allclose(hs_bf16, ref_hs, atol=1e-1, rtol=1e-1), "bf16 scan mismatch"

    print("KERNEL_OK")
</pallas_src>

<mosaic_0001>
module attributes {stable_mosaic.version = 11 : i64} {
  func.func @_core_rnn_scan_kernel(%arg0: i32, %arg1: i32, %arg2: memref<8x128xf32, #tpu.memory_space<vmem>>, %arg3: memref<1x8x64xf32, #tpu.memory_space<vmem>>, %arg4: memref<64x128xf32, #tpu.memory_space<vmem>>, %arg5: memref<128x128xf32, #tpu.memory_space<vmem>>, %arg6: memref<1x128xf32, #tpu.memory_space<vmem>>, %arg7: memref<1x8x128xf32, #tpu.memory_space<vmem>>, %arg8: memref<8x128xf32, #tpu.memory_space<vmem>>) attributes {dimension_semantics = [#tpu.dimension_semantics<parallel>, #tpu.dimension_semantics<arbitrary>], iteration_bounds = array<i64: 1, 1>, scalar_prefetch = 0 : i64, scratch_operands = 1 : i64, tpu.core_type = #tpu.core_type<tc>, window_params = [{transform_indices = @transform_0, window_bounds = array<i64: 8, 128>}, {transform_indices = @transform_1, window_bounds = array<i64: 1, 8, 64>}, {pipeline_mode = #tpu.pipeline_mode<synchronous>, transform_indices = @transform_2, window_bounds = array<i64: 64, 128>}, {pipeline_mode = #tpu.pipeline_mode<synchronous>, transform_indices = @transform_3, window_bounds = array<i64: 128, 128>}, {pipeline_mode = #tpu.pipeline_mode<synchronous>, transform_indices = @transform_4, window_bounds = array<i64: 1, 128>}, {transform_indices = @transform_5, window_bounds = array<i64: 1, 8, 128>}]} {
    %c0_i32 = arith.constant 0 : i32
    %0 = arith.cmpi eq, %arg1, %c0_i32 : i32
    %1 = arith.extui %0 : i1 to i32
    %c0_i32_0 = arith.constant 0 : i32
    %2 = arith.cmpi ne, %1, %c0_i32_0 : i32
    scf.if %2 {
      %c0_18 = arith.constant 0 : index
      %c0_19 = arith.constant 0 : index
      %23 = vector.load %arg2[%c0_18, %c0_19] : memref<8x128xf32, #tpu.memory_space<vmem>>, vector<8x128xf32>
      %c0_20 = arith.constant 0 : index
      %c0_21 = arith.constant 0 : index
      %24 = vector.load %arg8[%c0_20, %c0_21] : memref<8x128xf32, #tpu.memory_space<vmem>>, vector<8x128xf32>
      tpu.vector_store %arg8[%c0_20, %c0_21], %23 {strides = array<i32>} : memref<8x128xf32, #tpu.memory_space<vmem>>, vector<8x128xf32>,
    } else {
    }
    %c0 = arith.constant 0 : index
    %c0_1 = arith.constant 0 : index
    %c0_2 = arith.constant 0 : index
    %3 = vector.load %arg3[%c0, %c0_1, %c0_2] : memref<1x8x64xf32, #tpu.memory_space<vmem>>, vector<1x8x64xf32>
    %4 = vector.shape_cast %3 : vector<1x8x64xf32> to vector<8x64xf32>
    %c0_3 = arith.constant 0 : index
    %c0_4 = arith.constant 0 : index
    %5 = vector.load %arg4[%c0_3, %c0_4] : memref<64x128xf32, #tpu.memory_space<vmem>>, vector<64x128xf32>
    %cst = arith.constant dense<0.000000e+00> : vector<8x128xf32>
    %6 = tpu.matmul %4, %5, %cst {dimension_numbers = #tpu.dot_dimension_numbers<[1], [0], [0], [1], [0, 0, 1, 1], [], []>} : vector<8x64xf32>, vector<64x128xf32>, vector<8x128xf32> -> vector<8x128xf32>
    %7 = vector.shape_cast %6 : vector<8x128xf32> to vector<1x8x128xf32>
    %c0_5 = arith.constant 0 : index
    %c0_6 = arith.constant 0 : index
    %8 = vector.load %arg6[%c0_5, %c0_6] : memref<1x128xf32, #tpu.memory_space<vmem>>, vector<1x128xf32>
    %9 = vector.shape_cast %8 : vector<1x128xf32> to vector<1x1x128xf32>
    %10 = vector.broadcast %9 : vector<1x1x128xf32> to vector<1x8x128xf32>
    %11 = arith.addf %7, %10 : vector<1x8x128xf32>
    %c0_7 = arith.constant 0 : index
    %c0_8 = arith.constant 0 : index
    %12 = vector.load %arg5[%c0_7, %c0_8] : memref<128x128xf32, #tpu.memory_space<vmem>>, vector<128x128xf32>
    %c0_9 = arith.constant 0 : index
    %c0_10 = arith.constant 0 : index
    %13 = vector.load %arg8[%c0_9, %c0_10] : memref<8x128xf32, #tpu.memory_space<vmem>>, vector<8x128xf32>
    %14 = vector.shape_cast %11 : vector<1x8x128xf32> to vector<8x128xf32>
    %cst_11 = arith.constant dense<0.000000e+00> : vector<8x128xf32>
    %15 = tpu.matmul %13, %12, %cst_11 {dimension_numbers = #tpu.dot_dimension_numbers<[1], [0], [0], [1], [0, 0, 1, 1], [], []>} : vector<8x128xf32>, vector<128x128xf32>, vector<8x128xf32> -> vector<8x128xf32>
    %16 = arith.addf %14, %15 : vector<8x128xf32>
    %cst_12 = arith.constant 0.000000e+00 : f32
    %17 = vector.broadcast %cst_12 : f32 to vector<8x128xf32>
    %18 = arith.maximumf %16, %17 : vector<8x128xf32>
    %c0_13 = arith.constant 0 : index
    %c0_14 = arith.constant 0 : index
    %c0_15 = arith.constant 0 : index
    %19 = vector.load %arg7[%c0_13, %c0_14, %c0_15] : memref<1x8x128xf32, #tpu.memory_space<vmem>>, vector<1x8x128xf32>
    %20 = vector.shape_cast %19 : vector<1x8x128xf32> to vector<8x128xf32>
    %21 = vector.shape_cast %18 : vector<8x128xf32> to vector<1x8x128xf32>
    tpu.vector_store %arg7[%c0_13, %c0_14, %c0_15], %21 {strides = array<i32>} : memref<1x8x128xf32, #tpu.memory_space<vmem>>, vector<1x8x128xf32>,
    %c0_16 = arith.constant 0 : index
    %c0_17 = arith.constant 0 : index
    %22 = vector.load %arg8[%c0_16, %c0_17] : memref<8x128xf32, #tpu.memory_space<vmem>>, vector<8x128xf32>
    tpu.vector_store %arg8[%c0_16, %c0_17], %18 {strides = array<i32>} : memref<8x128xf32, #tpu.memory_space<vmem>>, vector<8x128xf32>,
    return
  }
  func.func @transform_0(%arg0: i32, %arg1: i32) -> (i32, i32) {
    %c0_i32 = arith.constant 0 : i32
    %c0_i32_0 = arith.constant 0 : i32
    return %arg0, %c0_i32 : i32, i32
  }
  func.func @transform_1(%arg0: i32, %arg1: i32) -> (i32, i32, i32) {
    %c0_i32 = arith.constant 0 : i32
    %c0_i32_0 = arith.constant 0 : i32
    return %arg1, %arg0, %c0_i32 : i32, i32, i32
  }
  func.func @transform_2(%arg0: i32, %arg1: i32) -> (i32, i32) {
    %c0_i32 = arith.constant 0 : i32
    %c0_i32_0 = arith.constant 0 : i32
    %c0_i32_1 = arith.constant 0 : i32
    return %c0_i32, %c0_i32_0 : i32, i32
  }
  func.func @transform_3(%arg0: i32, %arg1: i32) -> (i32, i32) {
    %c0_i32 = arith.constant 0 : i32
    %c0_i32_0 = arith.constant 0 : i32
    %c0_i32_1 = arith.constant 0 : i32
    return %c0_i32, %c0_i32_0 : i32, i32
  }
  func.func @transform_4(%arg0: i32, %arg1: i32) -> (i32, i32) {
    %c0_i32 = arith.constant 0 : i32
    %c0_i32_0 = arith.constant 0 : i32
    %c0_i32_1 = arith.constant 0 : i32
    return %c0_i32, %c0_i32_0 : i32, i32
  }
  func.func @transform_5(%arg0: i32, %arg1: i32) -> (i32, i32, i32) {
    %c0_i32 = arith.constant 0 : i32
    %c0_i32_0 = arith.constant 0 : i32
    return %arg1, %arg0, %c0_i32 : i32, i32, i32
  }
}

</mosaic_0001>

<bundles_post_ra>
// kernel: tpu_custom_call.1
= control target key start
LH: loop header
LB: loop body
LE: loop exit
PB: predicated region body
PF: predicated region fallthrough
CT: control target
= control target key end

     0   :  { %10 = vsyncpa [#allocation4], 0  ;;  %s640_s0 = inlined_call_operand.hbm [shape: f32[8,128], index: 0, kind: input, shape index: {}]   ;;  %s641_s1 = inlined_call_operand.hbm [shape: f32[1,8,64], index: 1, kind: input, shape index: {}]   ;;  %s642_s2 = inlined_call_operand.hbm [shape: f32[64,128], index: 2, kind: input, shape index: {}]   ;;  %s643_s3 = inlined_call_operand.hbm [shape: f32[128,128], index: 3, kind: input, shape index: {}]   ;;  %s644_s4 = inlined_call_operand.vmem [shape: f32[1,128], index: 4, kind: input, shape index: {}]   ;;  %s645_s5 = inlined_call_operand.hbm [shape: f32[1,8,128], index: 5, kind: output, shape index: {}]  }
   0x1   :  { %11 = vsyncpa [#allocation7], 0 }
   0x2   :  { %12 = vsyncpa [#allocation10], 0 }
   0x3   :  { %13 = vsyncpa [#allocation5], 0  ;;  %s525_s18 = smov [#allocation6]   ;;  %s526_s20 = smov [#allocation3]  }
   0x4   :  { %s30_s19 = sshll.u32 %s525_s18, 4  ;;  %s20_s21 = sshll.u32 %s526_s20, 4  ;;  %s31_s19 = int_to_ptr.vmem [resolvable:$true] %s30_s19  ;;  %s21_s21 = int_to_ptr.vmem [resolvable:$true] %s20_s21 }
   0x5   :  { %s407_s24 = scalar_lea.hbm %s641_s1, 128 }
   0x6   :  { %p408_p0 = scmp.ne.s32.totalorder %s641_s1, %s407_s24  ;;  %p411_p1 = scmp.lt.u32.totalorder %s407_s24, %s641_s1 }
   0x8   :  { %p413_p2 = pnand %p411_p1, %p408_p0 }
   0xa   :  { %416 = shalt.err (!%p413_p2)
}
   0xb   :  { %s417_s29 = scalar_lea.vmem %s31_s19, 128  ;;  %p422_p4 = scmp.lt.s32.totalorder %s31_s19, %s31_s19 }
   0xc   :  { %p418_p3 = scmp.ne.s32.totalorder %s31_s19, %s417_s29  ;;  %p423_p5 = scmp.lt.s32.totalorder %s417_s29, %s417_s29 }
   0xe   :  { %p424_p6 = por %p423_p5, %p422_p4 }
  0x10   :  { %p425_p7 = pnand %p424_p6, %p418_p3 }
  0x12   :  { %428 = shalt.err (!%p425_p7)
}
  0x13   :  { %33 = dma.hbm_to_vmem [thread:$0]  %s641_s1, 128, %s31_s19, [#allocation7]  }
  0x14   :  { %s429_s9 = scalar_lea.hbm %s640_s0, 128 }
  0x15   :  { %p430_p8 = scmp.ne.s32.totalorder %s640_s0, %s429_s9  ;;  %p433_p9 = scmp.lt.u32.totalorder %s429_s9, %s640_s0 }
  0x17   :  { %p435_p10 = pnand %p433_p9, %p430_p8 }
  0x19   :  { %438 = shalt.err (!%p435_p10)
}
  0x1a   :  { %s439_s14 = scalar_lea.vmem %s21_s21, 128  ;;  %p444_p12 = scmp.lt.s32.totalorder %s21_s21, %s21_s21 }
  0x1b   :  { %p440_p11 = scmp.ne.s32.totalorder %s21_s21, %s439_s14  ;;  %p445_p13 = scmp.lt.s32.totalorder %s439_s14, %s439_s14 }
  0x1d   :  { %p446_p0 = por %p445_p13, %p444_p12 }
  0x1f   :  { %p447_p1 = pnand %p446_p0, %p440_p11 }
  0x21   :  { %450 = shalt.err (!%p447_p1)
}
  0x22   :  { %23 = dma.hbm_to_vmem [thread:$0]  %s640_s0, 128, %s21_s21, [#allocation4]  }
  0x23   :  { %s527_s16 = smov [#allocation8]   ;;  %s451_s20 = scalar_lea.hbm %s642_s2, 1024 }
  0x24   :  { %s39_s17 = sshll.u32 %s527_s16, 4  ;;  %p452_p2 = scmp.ne.s32.totalorder %s642_s2, %s451_s20  ;;  %s40_s17 = int_to_ptr.vmem [resolvable:$true] %s39_s17 }
  0x25   :  { %p455_p3 = scmp.lt.u32.totalorder %s451_s20, %s642_s2 }
  0x27   :  { %p457_p4 = pnand %p455_p3, %p452_p2 }
  0x29   :  { %460 = shalt.err (!%p457_p4)
}
  0x2a   :  { %s461_s26 = scalar_lea.vmem %s40_s17, 1024  ;;  %p466_p6 = scmp.lt.s32.totalorder %s40_s17, %s40_s17 }
  0x2b   :  { %p462_p5 = scmp.ne.s32.totalorder %s40_s17, %s461_s26  ;;  %p467_p7 = scmp.lt.s32.totalorder %s461_s26, %s461_s26 }
  0x2d   :  { %p468_p8 = por %p467_p7, %p466_p6 }
  0x2f   :  { %p469_p9 = pnand %p468_p8, %p462_p5 }
  0x31   :  { %472 = shalt.err (!%p469_p9)
}
  0x32   :  { %s528_s0 = smov 128   ;;  %s529_s21 = smov 8  }
  0x33   :  { %45 = dma.hbm_to_vmem [thread:$0]  %s642_s2, 1024, %s40_s17, [#allocation7], %s528_s0, %s528_s0, %s529_s21  }
  0x34   :  { %s530_s29 = smov [#allocation9]   ;;  %s473_s8 = scalar_lea.hbm %s643_s3, 2048 }
  0x35   :  { %s51_s30 = sshll.u32 %s530_s29, 4  ;;  %p474_p10 = scmp.ne.s32.totalorder %s643_s3, %s473_s8  ;;  %s52_s30 = int_to_ptr.vmem [resolvable:$true] %s51_s30 }
  0x36   :  { %p477_p11 = scmp.lt.u32.totalorder %s473_s8, %s643_s3 }
  0x38   :  { %p479_p12 = pnand %p477_p11, %p474_p10 }
  0x3a   :  { %482 = shalt.err (!%p479_p12)
}
  0x3b   :  { %s483_s13 = scalar_lea.vmem %s52_s30, 2048  ;;  %p488_p0 = scmp.lt.s32.totalorder %s52_s30, %s52_s30 }
  0x3c   :  { %p484_p13 = scmp.ne.s32.totalorder %s52_s30, %s483_s13  ;;  %p489_p1 = scmp.lt.s32.totalorder %s483_s13, %s483_s13 }
  0x3e   :  { %p490_p2 = por %p489_p1, %p488_p0 }
  0x40   :  { %p491_p3 = pnand %p490_p2, %p484_p13 }
  0x42   :  { %494 = shalt.err (!%p491_p3)
}
  0x43   :  { %57 = dma.hbm_to_vmem [thread:$0]  %s643_s3, 2048, %s52_s30, [#allocation10], %s528_s0, %s528_s0, %s529_s21  }
  0x44   :  { %517 = dma.done.wait [#allocation4], 128  }
  0x45   :  { %518 = vsyncadd [#allocation4], 4294967168 }
  0x46   :  { %519 = dma.done.wait [#allocation7], 1152  }
  0x47   :  { %520 = vsyncadd [#allocation7], 4294966144 }
  0x48   :  { %521 = dma.done.wait [#allocation10], 2048  }
  0x49   :  { %522 = vsyncadd [#allocation10], 4294965248  ;;  %v531_v0 = vmov 0.0|0.0   ;;  %vm532_vm0 = vmmov 0   ;;  %v533_v1 = vmov 0.0   ;;  %v169_v2 = vld [vmem:[#allocation9] sm:$0xff] }
  0x4a   :  { %371 = vmatprep.subr.bf16.mxu0 %v531_v0  ;;  %359 = vmatprep.subr.bf16.mxu1 %v531_v0  ;;  %v170_v3 = vld [vmem:[#allocation9 + $0x8] sm:$0xff]  ;;  %v171_v4 = vld [vmem:[#allocation9 + $0x10] sm:$0xff]  ;;  %v172_v6 = vld [vmem:[#allocation9 + $0x18] sm:$0xff]  ;;  %vm87_vm1 = vcmask 523264   ;;  %s534_s15 = smov [#allocation11]  }
  0x4b   :  { %321 = vmatprep.mubr.msk.f32.mxu1 %vm532_vm0, %v533_v1  ;;  %356 = vmatprep.mubr.msk.f32.mxu0 %vm532_vm0, %v533_v1  ;;  %v372_v5 = vpack.c.bf16 %v170_v3, %v169_v2  ;;  %v79_v7 = vld [vmem:[#allocation8] sm:$0xff]  ;;  %v375_v8 = vpack.c.bf16 %v172_v6, %v171_v4  ;;  %v80_v10 = vld [vmem:[#allocation8 + $0x8] sm:$0xff]  ;;  %v81_v13 = vld [vmem:[#allocation8 + $0x10] sm:$0xff]  ;;  %s266_s16 = sshll.u32 %s534_s15, 4  ;;  %s267_s16 = int_to_ptr.vmem [resolvable:$true] %s266_s16 }
  0x4c   :  { %v173_v9 = vld [vmem:[#allocation9 + $0x20] sm:$0xff]  ;;  %v174_v11 = vld [vmem:[#allocation9 + $0x28] sm:$0xff]  ;;  %v360_v12 = vpack.c.bf16 %v80_v10, %v79_v7  ;;  %v82_v14 = vld [vmem:[#allocation8 + $0x18] sm:$0xff]  ;;  %s495_s17 = scalar_lea.vmem %s267_s16, 128  ;;  %p500_p5 = scmp.lt.s32.totalorder %s267_s16, %s267_s16 }
  0x4d   :  { %373 = vmatpush3.bf16.msra.mxu0 %v372_v5  ;;  %v363_v15 = vpack.c.bf16 %v82_v14, %v81_v13  ;;  %v378_v16 = vpack.c.bf16 %v174_v11, %v173_v9  ;;  %v83_v17 = vld [vmem:[#allocation8 + $0x20] sm:$0xff]  ;;  %v84_v18 = vld [vmem:[#allocation8 + $0x28] sm:$0xff]  ;;  %v175_v19 = vld [vmem:[#allocation9 + $0x30] sm:$0xff]  ;;  %p496_p4 = scmp.ne.s32.totalorder %s267_s16, %s495_s17  ;;  %p501_p6 = scmp.lt.s32.totalorder %s495_s17, %s495_s17 }
  0x4e   :  { %374 = vmatprep.subr.bf16.mxu0 %v531_v0  ;;  %361 = vmatpush3.bf16.msra.mxu1 %v360_v12  ;;  %v176_v20 = vld [vmem:[#allocation9 + $0x38] sm:$0xff]  ;;  %v366_v21 = vpack.c.bf16 %v84_v18, %v83_v17  ;;  %v85_v23 = vld [vmem:[#allocation8 + $0x30] sm:$0xff]  ;;  %v177_v25 = vld [vmem:[#allocation9 + $0x40] sm:$0xff] }
  0x4f   :  { %362 = vmatprep.subr.bf16.mxu1 %v531_v0  ;;  %v381_v22 = vpack.c.bf16 %v176_v20, %v175_v19  ;;  %v86_v24 = vld [vmem:[#allocation8 + $0x38] sm:$0xff]  ;;  %v178_v26 = vld [vmem:[#allocation9 + $0x48] sm:$0xff]  ;;  %v179_v29 = vld [vmem:[#allocation9 + $0x50] sm:$0xff]  ;;  %p502_p7 = por %p501_p6, %p500_p5 }
  0x50   :  { %v369_v27 = vpack.c.bf16 %v86_v24, %v85_v23  ;;  %v384_v28 = vpack.c.bf16 %v178_v26, %v177_v25  ;;  %v180_v30 = vld [vmem:[#allocation9 + $0x58] sm:$0xff]  ;;  %v181_v33 = vld [vmem:[#allocation9 + $0x60] sm:$0xff]  ;;  %v182_v34 = vld [vmem:[#allocation9 + $0x68] sm:$0xff] }
  0x51   :  { %376 = vmatpush3.bf16.msra.mxu0 %v375_v8  ;;  %v78_v31 = vld [vmem:[#allocation6] sm:$0xff]  ;;  %v387_v32 = vpack.c.bf16 %v180_v30, %v179_v29  ;;  %v390_v35 = vpack.c.bf16 %v182_v34, %v181_v33  ;;  %v183_v36 = vld [vmem:[#allocation9 + $0x70] sm:$0xff]  ;;  %p503_p8 = pnand %p502_p7, %p496_p4 }
  0x52   :  { %377 = vmatprep.subr.bf16.mxu0 %v531_v0  ;;  %364 = vmatpush3.bf16.msra.mxu1 %v363_v15  ;;  %v184_v37 = vld [vmem:[#allocation9 + $0x78] sm:$0xff]  ;;  %v76_v39 = vld [vmem:[#allocation3] sm:$0xff] }
  0x53   :  { %365 = vmatprep.subr.bf16.mxu1 %v531_v0  ;;  %v393_v38 = vpack.c.bf16 %v184_v37, %v183_v36  ;;  %v278_v42 = vld [vmem:[%s644_s4] ss:$0 sm:$0xff] }
  0x55   :  { %379 = vmatpush3.bf16.msra.mxu0 %v378_v16 }
  0x56   :  { %380 = vmatprep.subr.bf16.mxu0 %v531_v0  ;;  %367 = vmatpush3.bf16.msra.mxu1 %v366_v21 }
  0x57   :  { %368 = vmatprep.subr.bf16.mxu1 %v531_v0 }
  0x59   :  { %382 = vmatpush3.bf16.msra.mxu0 %v381_v22 }
  0x5a   :  { %383 = vmatprep.subr.bf16.mxu0 %v531_v0  ;;  %370 = vmatpush3.bf16.msra.mxu1 %v369_v27 }
  0x5d   :  { %385 = vmatpush3.bf16.msra.mxu0 %v384_v28  ;;  %322 = vmatmul.mubr.msk.f32.vlgmr.msra.gmra.mrb[0].mxu1 %vm87_vm1, %v78_v31 }
  0x5e   :  { %386 = vmatprep.subr.bf16.mxu0 %v531_v0 }
  0x61   :  { %388 = vmatpush3.bf16.msra.mxu0 %v387_v32 }
  0x62   :  { %389 = vmatprep.subr.bf16.mxu0 %v531_v0 }
  0x65   :  { %391 = vmatpush3.bf16.msra.mxu0 %v390_v35 }
  0x66   :  { %392 = vmatprep.subr.bf16.mxu0 %v531_v0 }
  0x69   :  { %394 = vmatpush3.bf16.msra.mxu0 %v393_v38 }
  0x6c   :  { %357 = vmatmul.mubr.f32.vlgmr.msra.gmra.mrb[0].mxu0 %v76_v39 }
 0x130   :  { %v157_v40 = vpop.f32.mrb[0].mxu1 }
 0x131   :  { %v323_v41 = vpop.f32.mrb[1].mxu1  ;;  %v168_v43 = vadd.f32 %v278_v42, %v157_v40 }
 0x13f   :  { %v252_v44 = vpop.f32.mrb[0].mxu0 }
 0x140   :  { %v256_v45 = vadd.f32 %v252_v44, %v168_v43  ;;  %v358_v46 = vpop.f32.mrb[1].mxu0 }
 0x142   :  { %v257_v47 = vmax.f32 %v256_v45, 0.0 }
 0x144   :  { %258 = vst [vmem:[#allocation11] sm:$0xff] %v257_v47 }
 0x145   :  { %506 = shalt.err (!%p503_p8)
}
 0x146   :  { %s507_s4 = scalar_lea.hbm %s645_s5, 128 }
 0x147   :  { %p508_p9 = scmp.ne.s32.totalorder %s645_s5, %s507_s4  ;;  %p511_p10 = scmp.lt.u32.totalorder %s507_s4, %s645_s5 }
 0x149   :  { %p513_p11 = pnand %p511_p10, %p508_p9 }
 0x14b   :  { %516 = shalt.err (!%p513_p11)
}
 0x14c   :  { %269 = dma.vmem_to_hbm [thread:$0]  %s267_s16, 128, %s645_s5, [#allocation5]  }
 0x14d   :  { %523 = dma.done.wait [#allocation5], 128  }
 0x14e   :  { %524 = vsyncadd [#allocation5], 4294967168 }
 0x14f   :  { %273 = vsyncpa [#allocation4], 1 }
 0x150   :  { %274 = vsyncpa [#allocation7], 1 }
 0x151   :  { %275 = vsyncpa [#allocation10], 1 }
 0x152   :  { %276 = vsyncpa [#allocation5], 1 }

</bundles_post_ra>
